<compile_context>
chip_gen: v5e
topology: v5e:2x2
jax: 0.10.0
libtpu: 0.0.40
codegen_flags: <defaults>
</compile_context>

<pallas_src>
import functools

import jax
import jax.numpy as jnp
from jax.experimental import pallas as pl
from jax.experimental.pallas import tpu as pltpu


def _round_up(n: int, m: int) -> int:
    return (n + m - 1) // m * m


def _sublane(dtype) -> int:
    # Minimal second-to-last tile dim per dtype width: f32 -> 8, bf16 -> 16,
    # int8/fp8 -> 32.
    return {4: 8, 2: 16, 1: 32}.get(jnp.dtype(dtype).itemsize, 8)


def _vmem_headroom_bytes() -> int:
    # Generation-aware ceiling for the scoped-VMEM limit. v7x has only 64 MiB
    # of physical VMEM per TensorCore; v5e/v6e have 128 MiB.
    try:
        cap = pltpu.get_tpu_info().vmem_capacity_bytes
    except Exception:
        cap = 64 * 2**20  # conservative (v7x-sized) fallback
    return min(cap - (16 << 20), 108 << 20)


def _tile_vmem_bytes(tb, in_f, bott, cls_p, itemsize):
    x_bytes = 2 * tb * in_f * itemsize                                  # x tile, double-buffered
    w_bytes = (in_f * bott + bott + bott * cls_p + cls_p) * itemsize    # params, single-buffered
    o_bytes = 2 * tb * (cls_p + bott) * itemsize                        # outputs, double-buffered
    h_bytes = tb * (bott + cls_p) * 4                                   # f32 intermediates
    return x_bytes + w_bytes + o_bytes + h_bytes


def _full_connect_kernel(x_ref, w1_ref, b1_ref, w2_ref, b2_ref,
                         logits_ref, bottleneck_ref):
    # First Linear: [tb, in] @ [in, bottleneck] + [1, bottleneck]  (f32 acc)
    h = jnp.dot(x_ref[...], w1_ref[...], preferred_element_type=jnp.float32)
    h = h + b1_ref[...].astype(jnp.float32)
    # LeakyReLU(negative_slope=0.2) — kept in f32 (v5e VPU has no bf16 path).
    h = jnp.where(h > 0, h, 0.2 * h)
    bottleneck_ref[...] = h.astype(bottleneck_ref.dtype)
    # Second Linear: [tb, bottleneck] @ [bottleneck, cls_p] + [1, cls_p]
    logits = jnp.dot(h.astype(w2_ref.dtype), w2_ref[...],
                     preferred_element_type=jnp.float32)
    logits_ref[...] = (logits + b2_ref[...].astype(jnp.float32)).astype(logits_ref.dtype)


def prepare_full_connect_params(w1_t, b1, w2_t, b2):
    """One-time (model-load) parameter prep, hoisted off the per-call path.

    Pads class_num up to a multiple of 128 (lane-dense logits stores, clean
    MXU N) and reshapes biases to (1, D) rows.
    Returns ((w1_t, b1_2d, w2_t_padded, b2_2d_padded), class_num).
    """
    class_num = w2_t.shape[1]
    cls_p = _round_up(class_num, 128)
    if cls_p != class_num:
        w2_t = jnp.pad(w2_t, ((0, 0), (0, cls_p - class_num)))
        b2 = jnp.pad(b2, ((0, cls_p - class_num),))
    params = (w1_t, b1.reshape(1, -1), w2_t, b2.reshape(1, -1))
    return params, class_num


@functools.partial(jax.jit, static_argnames=("class_num", "tb"))
def full_connect_forward_padded(x, w1_t, b1_2d, w2_t, b2_2d, *,
                                class_num=None, tb=None):
    """Forward of Full_Connect (dropout_p=None) on pre-padded parameters.

    x: [B, in_features]; w1_t: [in, bottleneck]; b1_2d: [1, bottleneck];
    w2_t: [bottleneck, cls_p]; b2_2d: [1, cls_p]  (cls_p a multiple of 128).
    Returns (logits [B, class_num], bottleneck [B, bottleneck_dim]).
    """
    B, in_features = x.shape
    bottleneck_dim = w1_t.shape[1]
    cls_p = w2_t.shape[1]
    out_dtype = x.dtype
    itemsize = jnp.dtype(x.dtype).itemsize
    sub = _sublane(x.dtype)
    headroom = _vmem_headroom_bytes()

    # --- Batch tile. Small batches: a single grid step (latency path; no
    # further splitting even on v7x's 2 TCs). Large batches: the largest
    # HBM-friendly tile that fits the per-generation VMEM budget; B > tb
    # guarantees grid >= 2 so both v7x TensorCores get work. No batch padding:
    # grid = ceil(B / tb) and Pallas masks the ragged boundary block. ---
    if tb is None:
        if B <= 512:
            tb = _round_up(B, sub)
        else:
            tb = 128
            for cand in (512, 256, 128):
                if _tile_vmem_bytes(cand, in_features, bottleneck_dim,
                                    cls_p, itemsize) <= headroom:
                    tb = cand
                    break
    grid = (pl.cdiv(B, tb),)

    # --- Scoped-VMEM limit: only raise it when the tiles need more than the
    # 32 MiB default (so we never *shrink* the pipeliner budget), and clamp to
    # the generation's physical headroom (v7x: 64 MiB total). ---
    needed = int(_tile_vmem_bytes(tb, in_features, bottleneck_dim,
                                  cls_p, itemsize) * 1.25) + (2 << 20)
    vmem_limit = min(needed, headroom) if needed > (32 << 20) else None

    cost = pl.CostEstimate(
        flops=2 * B * (in_features * bottleneck_dim + bottleneck_dim * cls_p),
        transcendentals=0,
        bytes_accessed=itemsize * (
            B * in_features
            + in_features * bottleneck_dim + bottleneck_dim
            + bottleneck_dim * cls_p + cls_p
            + B * (cls_p + bottleneck_dim)),
    )

    def _const_spec(shape):
        # Grid-invariant parameters: constant index_map, never re-fetched, so
        # single-buffer them (halves their VMEM footprint at zero cost).
        idx = lambda i: (0, 0)
        try:
            return pl.BlockSpec(shape, idx, pipeline_mode=pl.Buffered(1))
        except Exception:
            return pl.BlockSpec(shape, idx)  # fallback: default double-buffering

    logits_p, bottleneck = pl.pallas_call(
        _full_connect_kernel,
        out_shape=(
            jax.ShapeDtypeStruct((B, cls_p), out_dtype),
            jax.ShapeDtypeStruct((B, bottleneck_dim), out_dtype),
        ),
        grid_spec=pltpu.PrefetchScalarGridSpec(
            num_scalar_prefetch=0,
            grid=grid,
            in_specs=[
                pl.BlockSpec((tb, in_features), lambda i: (i, 0)),
                _const_spec((in_features, bottleneck_dim)),
                _const_spec((1, bottleneck_dim)),
                _const_spec((bottleneck_dim, cls_p)),
                _const_spec((1, cls_p)),
            ],
            out_specs=[
                pl.BlockSpec((tb, cls_p), lambda i: (i, 0)),
                pl.BlockSpec((tb, bottleneck_dim), lambda i: (i, 0)),
            ],
        ),
        compiler_params=pltpu.CompilerParams(
            dimension_semantics=("parallel",),
            vmem_limit_bytes=vmem_limit,
        ),
        cost_estimate=cost,
    )(x, w1_t, b1_2d, w2_t, b2_2d)

    # Only the tiny class-padding slice remains on the output path.
    if class_num is not None and class_num != cls_p:
        logits = logits_p[:, :class_num]
    else:
        logits = logits_p
    return logits, bottleneck


def _reference(x, w1_t, b1, w2_t, b2):
    h = x @ w1_t + b1
    h = jnp.where(h > 0, h, 0.2 * h)
    return h @ w2_t + b2, h


if __name__ == "__main__":
    # Small shapes consistent with the module (resnet fc head).
    in_features = 256
    bottleneck_dim = 128
    class_num = 31          # default class_num in the module

    key = jax.random.PRNGKey(0)
    kx, kw1, kb1, kw2, kb2 = jax.random.split(key, 5)

    # Deterministic synthetic parameters (PyTorch-Linear-like uniform init).
    lim1 = 1.0 / (in_features ** 0.5)
    w1_t = jax.random.uniform(kw1, (in_features, bottleneck_dim),
                              minval=-lim1, maxval=lim1, dtype=jnp.float32)
    b1 = jax.random.uniform(kb1, (bottleneck_dim,),
                            minval=-lim1, maxval=lim1, dtype=jnp.float32)
    lim2 = 1.0 / (bottleneck_dim ** 0.5)
    w2_t = jax.random.uniform(kw2, (bottleneck_dim, class_num),
                              minval=-lim2, maxval=lim2, dtype=jnp.float32)
    b2 = jax.random.uniform(kb2, (class_num,),
                            minval=-lim2, maxval=lim2, dtype=jnp.float32)

    # One-time parameter prep (model-load time), off the per-forward hot path.
    params, ncls = prepare_full_connect_params(w1_t, b1, w2_t, b2)

    def run(x):
        return full_connect_forward_padded(x, *params, class_num=ncls)

    # --- 1) Small batch, single grid step (f32). ---
    x = jax.random.normal(kx, (16, in_features), dtype=jnp.float32)
    logits, bott = run(x)
    jax.block_until_ready((logits, bott))
    rl, rb = _reference(x, w1_t, b1, w2_t, b2)
    assert logits.shape == (16, class_num) and bott.shape == (16, bottleneck_dim)
    assert jnp.allclose(logits, rl, atol=1e-4, rtol=1e-4)
    assert jnp.allclose(bott, rb, atol=1e-4, rtol=1e-4)

    # --- 2) Ragged batch (B not a multiple of 8): no host-side pad/slice,
    # the single partial block is masked by Pallas. ---
    x_odd = jax.random.normal(kx, (10, in_features), dtype=jnp.float32)
    lo, bo = run(x_odd)
    jax.block_until_ready((lo, bo))
    rlo, rbo = _reference(x_odd, w1_t, b1, w2_t, b2)
    assert lo.shape == (10, class_num) and bo.shape == (10, bottleneck_dim)
    assert jnp.allclose(lo, rlo, atol=1e-4, rtol=1e-4)
    assert jnp.allclose(bo, rbo, atol=1e-4, rtol=1e-4)

    # --- 3) Large batch: multi-step parallel grid with a ragged boundary
    # block (520 = 512 + 8), exercising the big-tile path. ---
    x_big = jax.random.normal(kx, (520, in_features), dtype=jnp.float32)
    lb_, bb_ = run(x_big)
    jax.block_until_ready((lb_, bb_))
    rlb_, rbb_ = _reference(x_big, w1_t, b1, w2_t, b2)
    assert lb_.shape == (520, class_num) and bb_.shape == (520, bottleneck_dim)
    assert jnp.allclose(lb_, rlb_, atol=1e-4, rtol=1e-4)
    assert jnp.allclose(bb_, rbb_, atol=1e-4, rtol=1e-4)

    # --- 4) bf16 path: native-rate MXU + half the HBM traffic; dtype-aware
    # sublane rounding (16 for bf16). Compared against an f32 reference built
    # from the same bf16-rounded parameters. ---
    w1b, b1b = w1_t.astype(jnp.bfloat16), b1.astype(jnp.bfloat16)
    w2b, b2b = w2_t.astype(jnp.bfloat16), b2.astype(jnp.bfloat16)
    params_bf, _ = prepare_full_connect_params(w1b, b1b, w2b, b2b)
    xb = x.astype(jnp.bfloat16)
    lbf, bbf = full_connect_forward_padded(xb, *params_bf, class_num=ncls)
    jax.block_until_ready((lbf, bbf))
    rlbf, rbbf = _reference(xb.astype(jnp.float32), w1b.astype(jnp.float32),
                            b1b.astype(jnp.float32), w2b.astype(jnp.float32),
                            b2b.astype(jnp.float32))
    assert lbf.dtype == jnp.bfloat16 and lbf.shape == (16, class_num)
    assert jnp.allclose(lbf.astype(jnp.float32), rlbf, atol=7e-2, rtol=7e-2)
    assert jnp.allclose(bbf.astype(jnp.float32), rbbf, atol=7e-2, rtol=7e-2)

    print("KERNEL_OK")
</pallas_src>

<mosaic_0001>
module attributes {stable_mosaic.version = 11 : i64} {
  func.func @_full_connect_kernel(%arg0: i32, %arg1: memref<16x256xf32, #tpu.memory_space<vmem>>, %arg2: memref<256x128xf32, #tpu.memory_space<vmem>>, %arg3: memref<1x128xf32, #tpu.memory_space<vmem>>, %arg4: memref<128x128xf32, #tpu.memory_space<vmem>>, %arg5: memref<1x128xf32, #tpu.memory_space<vmem>>, %arg6: memref<16x128xf32, #tpu.memory_space<vmem>>, %arg7: memref<16x128xf32, #tpu.memory_space<vmem>>) attributes {dimension_semantics = [#tpu.dimension_semantics<parallel>], iteration_bounds = array<i64: 1>, scalar_prefetch = 0 : i64, scratch_operands = 0 : i64, tpu.core_type = #tpu.core_type<tc>, window_params = [{transform_indices = @transform_0, window_bounds = array<i64: 16, 256>}, {pipeline_mode = #tpu.pipeline_mode<synchronous>, transform_indices = @transform_1, window_bounds = array<i64: 256, 128>}, {pipeline_mode = #tpu.pipeline_mode<synchronous>, transform_indices = @transform_2, window_bounds = array<i64: 1, 128>}, {pipeline_mode = #tpu.pipeline_mode<synchronous>, transform_indices = @transform_3, window_bounds = array<i64: 128, 128>}, {pipeline_mode = #tpu.pipeline_mode<synchronous>, transform_indices = @transform_4, window_bounds = array<i64: 1, 128>}, {transform_indices = @transform_5, window_bounds = array<i64: 16, 128>}, {transform_indices = @transform_6, window_bounds = array<i64: 16, 128>}]} {
    %c0 = arith.constant 0 : index
    %c0_0 = arith.constant 0 : index
    %0 = vector.load %arg1[%c0, %c0_0] : memref<16x256xf32, #tpu.memory_space<vmem>>, vector<16x256xf32>
    %c0_1 = arith.constant 0 : index
    %c0_2 = arith.constant 0 : index
    %1 = vector.load %arg2[%c0_1, %c0_2] : memref<256x128xf32, #tpu.memory_space<vmem>>, vector<256x128xf32>
    %cst = arith.constant dense<0.000000e+00> : vector<16x128xf32>
    %2 = tpu.matmul %0, %1, %cst {dimension_numbers = #tpu.dot_dimension_numbers<[1], [0], [0], [1], [0, 0, 1, 1], [], []>} : vector<16x256xf32>, vector<256x128xf32>, vector<16x128xf32> -> vector<16x128xf32>
    %c0_3 = arith.constant 0 : index
    %c0_4 = arith.constant 0 : index
    %3 = vector.load %arg3[%c0_3, %c0_4] : memref<1x128xf32, #tpu.memory_space<vmem>>, vector<1x128xf32>
    %4 = vector.broadcast %3 : vector<1x128xf32> to vector<16x128xf32>
    %5 = arith.addf %2, %4 : vector<16x128xf32>
    %cst_5 = arith.constant 0.000000e+00 : f32
    %6 = vector.broadcast %cst_5 : f32 to vector<16x128xf32>
    %7 = arith.cmpf ogt, %5, %6 : vector<16x128xf32>
    %cst_6 = arith.constant 2.000000e-01 : f32
    %8 = vector.broadcast %cst_6 : f32 to vector<16x128xf32>
    %9 = arith.mulf %8, %5 : vector<16x128xf32>
    %10 = arith.select %7, %5, %9 : vector<16x128xi1>, vector<16x128xf32>
    %c0_7 = arith.constant 0 : index
    %c0_8 = arith.constant 0 : index
    %11 = vector.load %arg7[%c0_7, %c0_8] : memref<16x128xf32, #tpu.memory_space<vmem>>, vector<16x128xf32>
    tpu.vector_store %arg7[%c0_7, %c0_8], %10 {strides = array<i32>} : memref<16x128xf32, #tpu.memory_space<vmem>>, vector<16x128xf32>,
    %c0_9 = arith.constant 0 : index
    %c0_10 = arith.constant 0 : index
    %12 = vector.load %arg4[%c0_9, %c0_10] : memref<128x128xf32, #tpu.memory_space<vmem>>, vector<128x128xf32>
    %cst_11 = arith.constant dense<0.000000e+00> : vector<16x128xf32>
    %13 = tpu.matmul %10, %12, %cst_11 {dimension_numbers = #tpu.dot_dimension_numbers<[1], [0], [0], [1], [0, 0, 1, 1], [], []>} : vector<16x128xf32>, vector<128x128xf32>, vector<16x128xf32> -> vector<16x128xf32>
    %c0_12 = arith.constant 0 : index
    %c0_13 = arith.constant 0 : index
    %14 = vector.load %arg5[%c0_12, %c0_13] : memref<1x128xf32, #tpu.memory_space<vmem>>, vector<1x128xf32>
    %15 = vector.broadcast %14 : vector<1x128xf32> to vector<16x128xf32>
    %16 = arith.addf %13, %15 : vector<16x128xf32>
    %c0_14 = arith.constant 0 : index
    %c0_15 = arith.constant 0 : index
    %17 = vector.load %arg6[%c0_14, %c0_15] : memref<16x128xf32, #tpu.memory_space<vmem>>, vector<16x128xf32>
    tpu.vector_store %arg6[%c0_14, %c0_15], %16 {strides = array<i32>} : memref<16x128xf32, #tpu.memory_space<vmem>>, vector<16x128xf32>,
    return
  }
  func.func @transform_0(%arg0: i32) -> (i32, i32) {
    %c0_i32 = arith.constant 0 : i32
    %c0_i32_0 = arith.constant 0 : i32
    return %arg0, %c0_i32 : i32, i32
  }
  func.func @transform_1(%arg0: i32) -> (i32, i32) {
    %c0_i32 = arith.constant 0 : i32
    %c0_i32_0 = arith.constant 0 : i32
    %c0_i32_1 = arith.constant 0 : i32
    return %c0_i32, %c0_i32_0 : i32, i32
  }
  func.func @transform_2(%arg0: i32) -> (i32, i32) {
    %c0_i32 = arith.constant 0 : i32
    %c0_i32_0 = arith.constant 0 : i32
    %c0_i32_1 = arith.constant 0 : i32
    return %c0_i32, %c0_i32_0 : i32, i32
  }
  func.func @transform_3(%arg0: i32) -> (i32, i32) {
    %c0_i32 = arith.constant 0 : i32
    %c0_i32_0 = arith.constant 0 : i32
    %c0_i32_1 = arith.constant 0 : i32
    return %c0_i32, %c0_i32_0 : i32, i32
  }
  func.func @transform_4(%arg0: i32) -> (i32, i32) {
    %c0_i32 = arith.constant 0 : i32
    %c0_i32_0 = arith.constant 0 : i32
    %c0_i32_1 = arith.constant 0 : i32
    return %c0_i32, %c0_i32_0 : i32, i32
  }
  func.func @transform_5(%arg0: i32) -> (i32, i32) {
    %c0_i32 = arith.constant 0 : i32
    %c0_i32_0 = arith.constant 0 : i32
    return %arg0, %c0_i32 : i32, i32
  }
  func.func @transform_6(%arg0: i32) -> (i32, i32) {
    %c0_i32 = arith.constant 0 : i32
    %c0_i32_0 = arith.constant 0 : i32
    return %arg0, %c0_i32 : i32, i32
  }
}

</mosaic_0001>

<bundles_post_ra>
// kernel: full_connect_forward_padded.1
= control target key start
LH: loop header
LB: loop body
LE: loop exit
PB: predicated region body
PF: predicated region fallthrough
CT: control target
= control target key end

     0   :  { %12 = vsyncpa [#allocation3], 0  ;;  %s480_s0 = inlined_call_operand.hbm [shape: f32[16,256], index: 0, kind: input, shape index: {}]   ;;  %s481_s1 = inlined_call_operand.hbm [shape: f32[256,128], index: 1, kind: input, shape index: {}]   ;;  %s482_s2 = inlined_call_operand.vmem [shape: f32[1,128], index: 2, kind: input, shape index: {}]   ;;  %s483_s3 = inlined_call_operand.hbm [shape: f32[128,128], index: 3, kind: input, shape index: {}]   ;;  %s484_s4 = inlined_call_operand.vmem [shape: f32[1,128], index: 4, kind: input, shape index: {}]   ;;  %s485_s5 = inlined_call_operand.hbm [shape: f32[16,128], index: 5, kind: output, shape index: {0}]   ;;  %s486_s6 = inlined_call_operand.hbm [shape: f32[16,128], index: 6, kind: output, shape index: {1}]  }
   0x1   :  { %13 = vsyncpa [#allocation6], 0 }
   0x2   :  { %14 = vsyncpa [#allocation4], 0  ;;  %s33_s23 = sshll.u32 %s481_s1, 4  ;;  %s34_s23 = int_to_ptr.hbm [resolvable:$true] %s33_s23 }
   0x3   :  { %15 = vsyncpa [#allocation10], 0  ;;  %s403_s24 = smov [#allocation5]   ;;  %s20_s28 = sshll.u32 %s480_s0, 4  ;;  %s21_s28 = int_to_ptr.hbm [resolvable:$true] %s20_s28 }
   0x4   :  { %s35_s25 = sshll.u32 %s403_s24, 4  ;;  %s404_s29 = smov 128   ;;  %s36_s25 = int_to_ptr.vmem [resolvable:$true] %s35_s25 }
   0x5   :  { %s405_s30 = smov 8   ;;  %s406_s7 = smov [#allocation2]  }
   0x6   :  { %41 = dma.hbm_to_vmem [thread:$0]  %s34_s23, 4096, %s36_s25, [#allocation6], %s404_s29, %s404_s29, %s405_s30  }
   0x7   :  { %s22_s8 = sshll.u32 %s406_s7, 4  ;;  %s407_s1 = smov 256   ;;  %s23_s8 = int_to_ptr.vmem [resolvable:$true] %s22_s8 }
   0x8   :  { %s408_s9 = smov 16   ;;  %s48_s12 = sshll.u32 %s483_s3, 4  ;;  %s49_s12 = int_to_ptr.hbm [resolvable:$true] %s48_s12 }
   0x9   :  { %28 = dma.hbm_to_vmem [thread:$0]  %s21_s28, 512, %s23_s8, [#allocation3], %s407_s1, %s407_s1, %s408_s9  }
   0xa   :  { %s409_s13 = smov [#allocation7]  }
   0xb   :  { %s50_s0 = sshll.u32 %s409_s13, 4  ;;  %s51_s0 = int_to_ptr.vmem [resolvable:$true] %s50_s0 }
   0xc   :  { %56 = dma.hbm_to_vmem [thread:$0]  %s49_s12, 2048, %s51_s0, [#allocation6], %s404_s29, %s404_s29, %s405_s30  }
   0xd   :  { %395 = dma.done.wait [#allocation3], 512  }
   0xe   :  { %396 = vsyncadd [#allocation3], 4294966784 }
   0xf   :  { %397 = dma.done.wait [#allocation6], 6144  }
  0x10   :  { %398 = vsyncadd [#allocation6], 4294961152  ;;  %v90_v0 = vld [vmem:[#allocation5 + $0x78] sm:$0xff]  ;;  %v89_v2 = vld [vmem:[#allocation5 + $0x70] sm:$0xff]  ;;  %s410_s15 = smov [#allocation9]   ;;  %s229_s18 = sshll.u32 %s486_s6, 4  ;;  %s230_s18 = int_to_ptr.hbm [resolvable:$true] %s229_s18 }
  0x11   :  { %v106_v1 = vld [vmem:[#allocation5 + $0xf8] sm:$0xff]  ;;  %111 = vmatpush.msra.mxu0 %v90_v0  ;;  %248 = vmatpush.msra.mxu3 %v90_v0  ;;  %v105_v3 = vld [vmem:[#allocation5 + $0xf0] sm:$0xff]  ;;  %v88_v4 = vld [vmem:[#allocation5 + $0x68] sm:$0xff]  ;;  %s411_s21 = smov [#allocation8]   ;;  %s216_s25 = sshll.u32 %s485_s5, 4  ;;  %s217_s25 = int_to_ptr.hbm [resolvable:$true] %s216_s25 }
  0x12   :  { %134 = vmatpush.msra.mxu1 %v106_v1  ;;  %v104_v5 = vld [vmem:[#allocation5 + $0xe8] sm:$0xff]  ;;  %v87_v6 = vld [vmem:[#allocation5 + $0x60] sm:$0xff]  ;;  %v86_v8 = vld [vmem:[#allocation5 + $0x58] sm:$0xff]  ;;  %s214_s22 = sshll.u32 %s411_s21, 4  ;;  %s215_s22 = int_to_ptr.vmem [resolvable:$true] %s214_s22 }
  0x13   :  { %112 = vmatpush.msra.mxu0 %v89_v2  ;;  %249 = vmatpush.msra.mxu3 %v89_v2  ;;  %v103_v7 = vld [vmem:[#allocation5 + $0xe0] sm:$0xff]  ;;  %v102_v9 = vld [vmem:[#allocation5 + $0xd8] sm:$0xff]  ;;  %v85_v10 = vld [vmem:[#allocation5 + $0x50] sm:$0xff] }
  0x14   :  { %135 = vmatpush.msra.mxu1 %v105_v3  ;;  %v101_v11 = vld [vmem:[#allocation5 + $0xd0] sm:$0xff]  ;;  %v84_v12 = vld [vmem:[#allocation5 + $0x48] sm:$0xff]  ;;  %v83_v14 = vld [vmem:[#allocation5 + $0x40] sm:$0xff] }
  0x15   :  { %113 = vmatpush.msra.mxu0 %v88_v4  ;;  %250 = vmatpush.msra.mxu3 %v88_v4  ;;  %v100_v13 = vld [vmem:[#allocation5 + $0xc8] sm:$0xff]  ;;  %v180_v15 = vld [vmem:[#allocation7 + $0x78] sm:$0xff]  ;;  %v99_v16 = vld [vmem:[#allocation5 + $0xc0] sm:$0xff] }
  0x16   :  { %136 = vmatpush.msra.mxu1 %v104_v5  ;;  %v179_v17 = vld [vmem:[#allocation7 + $0x70] sm:$0xff]  ;;  %v82_v18 = vld [vmem:[#allocation5 + $0x38] sm:$0xff]  ;;  %185 = vmatpush.msra.mxu2 %v180_v15  ;;  %v178_v20 = vld [vmem:[#allocation7 + $0x68] sm:$0xff] }
  0x17   :  { %114 = vmatpush.msra.mxu0 %v87_v6  ;;  %251 = vmatpush.msra.mxu3 %v87_v6  ;;  %v98_v19 = vld [vmem:[#allocation5 + $0xb8] sm:$0xff]  ;;  %v81_v21 = vld [vmem:[#allocation5 + $0x30] sm:$0xff]  ;;  %v177_v23 = vld [vmem:[#allocation7 + $0x60] sm:$0xff] }
  0x18   :  { %137 = vmatpush.msra.mxu1 %v103_v7  ;;  %186 = vmatpush.msra.mxu2 %v179_v17  ;;  %v97_v22 = vld [vmem:[#allocation5 + $0xb0] sm:$0xff]  ;;  %v80_v24 = vld [vmem:[#allocation5 + $0x28] sm:$0xff]  ;;  %v176_v26 = vld [vmem:[#allocation7 + $0x58] sm:$0xff] }
  0x19   :  { %115 = vmatpush.msra.mxu0 %v86_v8  ;;  %252 = vmatpush.msra.mxu3 %v86_v8  ;;  %v96_v25 = vld [vmem:[#allocation5 + $0xa8] sm:$0xff]  ;;  %v79_v27 = vld [vmem:[#allocation5 + $0x20] sm:$0xff]  ;;  %v175_v29 = vld [vmem:[#allocation7 + $0x50] sm:$0xff] }
  0x1a   :  { %138 = vmatpush.msra.mxu1 %v102_v9  ;;  %187 = vmatpush.msra.mxu2 %v178_v20  ;;  %v95_v28 = vld [vmem:[#allocation5 + $0xa0] sm:$0xff]  ;;  %v78_v30 = vld [vmem:[#allocation5 + $0x18] sm:$0xff]  ;;  %v174_v32 = vld [vmem:[#allocation7 + $0x48] sm:$0xff] }
  0x1b   :  { %116 = vmatpush.msra.mxu0 %v85_v10  ;;  %253 = vmatpush.msra.mxu3 %v85_v10  ;;  %v94_v31 = vld [vmem:[#allocation5 + $0x98] sm:$0xff]  ;;  %v77_v33 = vld [vmem:[#allocation5 + $0x10] sm:$0xff]  ;;  %v173_v35 = vld [vmem:[#allocation7 + $0x40] sm:$0xff] }
  0x1c   :  { %139 = vmatpush.msra.mxu1 %v101_v11  ;;  %188 = vmatpush.msra.mxu2 %v177_v23  ;;  %v93_v34 = vld [vmem:[#allocation5 + $0x90] sm:$0xff]  ;;  %v76_v36 = vld [vmem:[#allocation5 + $0x8] sm:$0xff]  ;;  %v172_v38 = vld [vmem:[#allocation7 + $0x38] sm:$0xff] }
  0x1d   :  { %117 = vmatpush.msra.mxu0 %v84_v12  ;;  %254 = vmatpush.msra.mxu3 %v84_v12  ;;  %v92_v37 = vld [vmem:[#allocation5 + $0x88] sm:$0xff]  ;;  %v75_v39 = vld [vmem:[#allocation5] sm:$0xff]  ;;  %v73_v42 = vld [vmem:[#allocation2 + $0x10] sm:$0xff] }
  0x1e   :  { %140 = vmatpush.msra.mxu1 %v100_v13  ;;  %189 = vmatpush.msra.mxu2 %v176_v26  ;;  %v91_v40 = vld [vmem:[#allocation5 + $0x80] sm:$0xff]  ;;  %v72_v43 = vld [vmem:[#allocation2 + $0x8] sm:$0xff]  ;;  %v171_v44 = vld [vmem:[#allocation7 + $0x30] sm:$0xff] }
  0x1f   :  { %118 = vmatpush.msra.mxu0 %v83_v14  ;;  %255 = vmatpush.msra.mxu3 %v83_v14  ;;  %v71_v41 = vld [vmem:[#allocation2] sm:$0xff]  ;;  %v170_v45 = vld [vmem:[#allocation7 + $0x28] sm:$0xff]  ;;  %v74_v47 = vld [vmem:[#allocation2 + $0x18] sm:$0xff] }
  0x20   :  { %141 = vmatpush.msra.mxu1 %v99_v16  ;;  %190 = vmatpush.msra.mxu2 %v175_v29  ;;  %v169_v46 = vld [vmem:[#allocation7 + $0x20] sm:$0xff]  ;;  %v168_v48 = vld [vmem:[#allocation7 + $0x18] sm:$0xff]  ;;  %v167_v49 = vld [vmem:[#allocation7 + $0x10] sm:$0xff] }
  0x21   :  { %119 = vmatpush.msra.mxu0 %v82_v18  ;;  %256 = vmatpush.msra.mxu3 %v82_v18  ;;  %v166_v50 = vld [vmem:[#allocation7 + $0x8] sm:$0xff]  ;;  %v165_v51 = vld [vmem:[#allocation7] sm:$0xff] }
  0x22   :  { %142 = vmatpush.msra.mxu1 %v98_v19  ;;  %191 = vmatpush.msra.mxu2 %v174_v32  ;;  %v273_v52 = vld [vmem:[%s482_s2] ss:$0 sm:$0xff]  ;;  %s227_s2 = sshll.u32 %s410_s15, 4  ;;  %s228_s2 = int_to_ptr.vmem [resolvable:$true] %s227_s2 }
  0x23   :  { %120 = vmatpush.msra.mxu0 %v81_v21  ;;  %257 = vmatpush.msra.mxu3 %v81_v21  ;;  %v274_v1 = vld [vmem:[%s484_s4] ss:$0 sm:$0xff] }
  0x24   :  { %143 = vmatpush.msra.mxu1 %v97_v22  ;;  %192 = vmatpush.msra.mxu2 %v173_v35 }
  0x25   :  { %121 = vmatpush.msra.mxu0 %v80_v24  ;;  %258 = vmatpush.msra.mxu3 %v80_v24 }
  0x26   :  { %144 = vmatpush.msra.mxu1 %v96_v25  ;;  %193 = vmatpush.msra.mxu2 %v172_v38 }
  0x27   :  { %122 = vmatpush.msra.mxu0 %v79_v27  ;;  %259 = vmatpush.msra.mxu3 %v79_v27 }
  0x28   :  { %145 = vmatpush.msra.mxu1 %v95_v28  ;;  %194 = vmatpush.msra.mxu2 %v171_v44 }
  0x29   :  { %123 = vmatpush.msra.mxu0 %v78_v30  ;;  %260 = vmatpush.msra.mxu3 %v78_v30 }
  0x2a   :  { %146 = vmatpush.msra.mxu1 %v94_v31  ;;  %195 = vmatpush.msra.mxu2 %v170_v45 }
  0x2b   :  { %124 = vmatpush.msra.mxu0 %v77_v33  ;;  %261 = vmatpush.msra.mxu3 %v77_v33 }
  0x2c   :  { %147 = vmatpush.msra.mxu1 %v93_v34  ;;  %196 = vmatpush.msra.mxu2 %v169_v46 }
  0x2d   :  { %125 = vmatpush.msra.mxu0 %v76_v36  ;;  %262 = vmatpush.msra.mxu3 %v76_v36 }
  0x2e   :  { %148 = vmatpush.msra.mxu1 %v92_v37  ;;  %197 = vmatpush.msra.mxu2 %v168_v48 }
  0x2f   :  { %126 = vmatpush.msra.mxu0 %v75_v39  ;;  %263 = vmatpush.msra.mxu3 %v75_v39 }
  0x30   :  { %149 = vmatpush.msra.mxu1 %v91_v40  ;;  %127 = vmatmul.f32.vlgmr.msra.gmra.mxu0 %v71_v41 }
  0x31   :  { %130 = vmatmul.f32.vlgmr.msra.gmra.mxu3 %v73_v42  ;;  %150 = vmatmul.f32.vlgmr.msra.gmra.mxu1 %v72_v43 }
  0x32   :  { %198 = vmatpush.msra.mxu2 %v167_v49 }
  0x34   :  { %199 = vmatpush.msra.mxu2 %v166_v50 }
  0x36   :  { %200 = vmatpush.msra.mxu2 %v165_v51 }
  0x39   :  { %153 = vmatmul.f32.gmra.mxu1 %v74_v47 }
  0xad   :  { %v128_v53 = vpop.f32.mrf.mxu0 }
  0xae   :  { %v129_v54 = vadd.f32 %v273_v52, %v128_v53  ;;  %v151_v55 = vpop.f32.mrf.mxu1 }
  0xb0   :  { %v152_v56 = vadd.f32 %v151_v55, %v129_v54 }
  0xb2   :  { %vm157_vm0 = vcmp.gt.f32.partialorder %v152_v56, 0.0  ;;  %v159_v57 = vmul.f32 0.2, %v152_v56 }
  0xb4   :  { %v131_v58 = vpop.f32.mrf.mxu3  ;;  %v161_v59 = vsel %vm157_vm0, %v152_v56, %v159_v57 }
  0xb5   :  { %v132_v60 = vadd.f32 %v273_v52, %v131_v58  ;;  %163 = vst [vmem:[#allocation9] sm:$0xff] %v161_v59  ;;  %201 = vmatmul.f32.vlgmr.msra.gmra.mxu2 %v161_v59 }
  0xb6   :  { %v154_v61 = vpop.f32.mrf.mxu1 }
  0xb7   :  { %v155_v62 = vadd.f32 %v154_v61, %v132_v60 }
  0xb9   :  { %vm158_vm1 = vcmp.gt.f32.partialorder %v155_v62, 0.0  ;;  %v160_v63 = vmul.f32 0.2, %v155_v62 }
  0xbb   :  { %v162_v0 = vsel %vm158_vm1, %v155_v62, %v160_v63 }
  0xbc   :  { %164 = vst [vmem:[#allocation9 + $0x8] sm:$0xff] %v162_v0 }
  0xbd   :  { %204 = vmatmul.f32.gmra.mxu2 %v162_v0  ;;  %235 = dma.vmem_to_hbm [thread:$0]  %s228_s2, 256, %s230_s18, [#allocation10], %s404_s29, %s404_s29, %s405_s30  }
 0x138   :  { %v202_v2 = vpop.f32.mrf.mxu2 }
 0x139   :  { %v203_v3 = vadd.f32 %v274_v1, %v202_v2 }
 0x13b   :  { %208 = vst [vmem:[#allocation8] sm:$0xff] %v203_v3 }
 0x140   :  { %v205_v4 = vpop.f32.mrf.mxu2 }
 0x141   :  { %v206_v5 = vadd.f32 %v274_v1, %v205_v4 }
 0x143   :  { %209 = vst [vmem:[#allocation8 + $0x8] sm:$0xff] %v206_v5 }
 0x144   :  { %222 = dma.vmem_to_hbm [thread:$0]  %s215_s22, 256, %s217_s25, [#allocation4], %s404_s29, %s404_s29, %s405_s30  }
 0x145   :  { %399 = dma.done.wait [#allocation4], 256  }
 0x146   :  { %400 = vsyncadd [#allocation4], 4294967040 }
 0x147   :  { %401 = dma.done.wait [#allocation10], 256  }
 0x148   :  { %402 = vsyncadd [#allocation10], 4294967040 }
 0x149   :  { %244 = vsyncpa [#allocation3], 1 }
 0x14a   :  { %245 = vsyncpa [#allocation6], 1 }
 0x14b   :  { %246 = vsyncpa [#allocation4], 1 }
 0x14c   :  { %247 = vsyncpa [#allocation10], 1 }

</bundles_post_ra>
